<compile_context>
chip_gen: v7x
topology: tpu7x:2x2x1
jax: 0.10.0
libtpu: 0.0.40
codegen_flags: <defaults>
</compile_context>

<pallas_src>
import jax
import jax.numpy as jnp
import numpy as np
from jax.experimental import pallas as pl
from jax.experimental.pallas import tpu as pltpu


def _lgl_inr_kernel(beta):
    eps = 1e-7

    def kernel(targets_ref, logits_ref, out_ref, acc_ref, cnt_ref):
        i = pl.program_id(0)
        C = acc_ref.shape[0]

        @pl.when(i == 0)
        def _init():
            acc_ref[...] = jnp.zeros_like(acc_ref)
            cnt_ref[...] = jnp.zeros_like(cnt_ref)

        # ---------------- hot loop: per-tile accumulation ----------------
        logits = logits_ref[...].astype(jnp.float32)     # (TB, C) upcast in-kernel
        tgt = targets_ref[...]                           # (1, TB) int32
        TB = logits.shape[0]

        probs = jax.nn.sigmoid(logits)                   # EUP
        logp_pos = jnp.log(probs + eps)                  # EUP (single log pass)
        # log(1 - sigmoid(x)) = log(sigmoid(x)) - x  -> saves a second log over (TB, C)
        logp_neg = logp_pos - logits

        # one-hot built directly transposed: (C, TB), so the matmul below is a
        # standard last-dim contraction for the MXU.
        class_ids = jax.lax.broadcasted_iota(jnp.int32, (C, TB), 0)
        oh_t = (class_ids == tgt).astype(jnp.float32)    # (C, TB)

        # per-class sample counts (VPU/XLU reduce, no MXU pass)
        cnt_ref[...] += jnp.sum(oh_t, axis=1, keepdims=True)        # (C, 1)

        # single fused MXU pass: [S_p | S_n | S_pos] partial sums
        rhs = jnp.concatenate([probs, logp_neg, logp_pos], axis=1)  # (TB, 3C)
        acc_ref[...] += jnp.dot(oh_t, rhs, preferred_element_type=jnp.float32)

        # ---------------- finalization: last grid step only ----------------
        @pl.when(i == pl.num_programs(0) - 1)
        def _finalize():
            counts = cnt_ref[...]                        # (C, 1)
            present = counts > 0.0                       # (C, 1) bool
            inv_n = pl.reciprocal(jnp.maximum(counts, 1.0), approx=True)

            acc = acc_ref[...]                           # (C, 3C)
            s_p = acc[:, :C]                             # sum of probs per class row
            s_n = acc[:, C:2 * C]                        # sum of log(1-p) per class row
            s_pos = acc[:, 2 * C:]                       # sum of log(p)   per class row

            row_ids = jax.lax.broadcasted_iota(jnp.int32, (C, C), 0)
            col_ids = jax.lax.broadcasted_iota(jnp.int32, (C, C), 1)
            eye = row_ids == col_ids

            # positive part: sum_k present S_pos[k, k] / n_k  (absent rows are exactly 0)
            loss_pos = jnp.sum(jnp.where(eye, s_pos * inv_n, 0.0))

            mean_probs = s_p * inv_n                     # (C, C)
            mean_loss_neg = s_n * inv_n                  # (C, C); diagonal gets weight 0

            # per target class k (column): masked softmax over the OTHER present
            # classes m (rows) of beta * mean_probs[m, k], weighting mean_loss_neg.
            mask = jnp.logical_and(present, jnp.logical_not(eye))   # (C, C)
            logit_w = jnp.where(mask, beta * mean_probs, jnp.float32(-1e30))
            maxv = jnp.max(logit_w, axis=0, keepdims=True)          # (1, C)
            expw = jnp.where(mask, jnp.exp(logit_w - maxv), 0.0)
            denom = jnp.sum(expw, axis=0, keepdims=True)
            weight = expw * pl.reciprocal(jnp.maximum(denom, 1e-20), approx=True)
            loss_neg = jnp.sum(weight * mean_loss_neg)

            out_ref[0, 0] = -(loss_pos + loss_neg)

    return kernel


def lgl_inr_loss(logits, targets, beta=1.0, block_b=512):
    """Pallas implementation of LGL_INR.forward (detach_weight has no fwd effect)."""
    B, C = logits.shape
    targets = targets.astype(jnp.int32)

    if B <= block_b:
        TB, Bp = B, B                         # single tile, no padding needed
    else:
        # Multi-tile: targets block is (1, TB) so TB must be a lane multiple (128).
        TB = max(128, (block_b // 128) * 128)
        Bp = ((B + TB - 1) // TB) * TB
    num_tiles = Bp // TB

    if Bp != B:
        # Sentinel target == C never matches any class -> padded rows contribute 0.
        logits = jnp.pad(logits, ((0, Bp - B), (0, 0)))
        targets = jnp.pad(targets, (0, Bp - B), constant_values=C)
    targets_row = targets.reshape(1, Bp)

    # VMEM budget (also fine on v7x's 32 MiB default scoped VMEM): double-buffered
    # (TB, C) logits + (1, TB) targets blocks + (C, 3C) & (C, 1) f32 accumulators.
    out = pl.pallas_call(
        _lgl_inr_kernel(float(beta)),
        out_shape=jax.ShapeDtypeStruct((1, 1), jnp.float32),
        grid=(num_tiles,),
        in_specs=[
            pl.BlockSpec((1, TB), lambda i: (0, i)),   # targets, lane-major row
            pl.BlockSpec((TB, C), lambda i: (i, 0)),   # logits tile (native dtype)
        ],
        out_specs=pl.BlockSpec(memory_space=pltpu.MemorySpace.SMEM),
        scratch_shapes=[
            pltpu.VMEM((C, 3 * C), jnp.float32),       # [S_p | S_n | S_pos] accumulator
            pltpu.VMEM((C, 1), jnp.float32),           # per-class counts
        ],
        compiler_params=pltpu.CompilerParams(
            dimension_semantics=("arbitrary",)),       # batch axis is a reduction
    )(targets_row, logits)
    return out[0, 0]


def _reference_loss(inputs, targets, beta=1.0):
    # Direct numpy transcription of the PyTorch forward (float64), for checking.
    inputs = np.asarray(inputs, dtype=np.float64)
    targets = np.asarray(targets)
    eps = 1e-7
    probs = 1.0 / (1.0 + np.exp(-inputs))
    B, C = probs.shape
    onehot = np.zeros((B, C))
    onehot[np.arange(B), targets] = 1.0
    size_class = onehot.sum(0)
    loss_pos = 0.0
    mean_probs, mean_loss_neg = [], []
    for k in range(C):
        idx = onehot[:, k].astype(bool)
        if idx.sum() == 0:
            continue
        t_k = onehot[idx]
        p_k = probs[idx]
        mp = p_k.mean(0).copy()
        mp[k] = -1.0
        mean_probs.append(mp)
        loss_pos += (t_k * np.log(p_k + eps)).sum() / size_class[k]
        mean_loss_neg.append(((1.0 - t_k) * np.log(1.0 - p_k + eps)).mean(0))
    mean_probs = np.stack(mean_probs)
    mean_loss_neg = np.stack(mean_loss_neg)
    loss_neg = 0.0
    for k in range(C):
        idxn = mean_probs[:, k] != -1.0
        pnk = mean_probs[idxn, k]
        if pnk.size == 0:
            continue  # softmax over empty tensor contributes 0
        z = beta * pnk
        w = np.exp(z - z.max())
        w /= w.sum()
        loss_neg += (w * mean_loss_neg[idxn, k]).sum()
    return -(loss_pos + loss_neg)


if __name__ == "__main__":
    key = jax.random.PRNGKey(0)
    k1, k2, k3, k4 = jax.random.split(key, 4)

    # Tolerance accounts for f32 (vs f64 ref), approx-reciprocal, and the
    # log(1-p) identity's slightly different eps regularization.
    RTOL = ATOL = 2e-3

    # Case 1: tiny single-tile problem (grid = (1,)).
    B1, C1 = 8, 16
    logits1 = jax.random.normal(k1, (B1, C1), dtype=jnp.float32)
    targets1 = jax.random.randint(k2, (B1,), 0, C1, dtype=jnp.int32)
    loss1 = jax.block_until_ready(lgl_inr_loss(logits1, targets1, beta=1.0))
    ref1 = _reference_loss(np.asarray(logits1), np.asarray(targets1), beta=1.0)
    assert np.allclose(float(loss1), ref1, rtol=RTOL, atol=ATOL), (float(loss1), ref1)

    # Case 2: multi-tile grid with batch padding (B not a multiple of the block).
    B2, C2 = 200, 16
    logits2 = jax.random.normal(k3, (B2, C2), dtype=jnp.float32)
    targets2 = jax.random.randint(k4, (B2,), 0, C2, dtype=jnp.int32)
    loss2 = jax.block_until_ready(
        lgl_inr_loss(logits2, targets2, beta=1.0, block_b=128))
    ref2 = _reference_loss(np.asarray(logits2), np.asarray(targets2), beta=1.0)
    assert np.allclose(float(loss2), ref2, rtol=RTOL, atol=ATOL), (float(loss2), ref2)

    print("KERNEL_OK")
</pallas_src>

<mosaic_0001>
module attributes {stable_mosaic.version = 11 : i64} {
  func.func @kernel(%arg0: i32, %arg1: memref<1x8xi32, #tpu.memory_space<vmem>>, %arg2: memref<8x16xf32, #tpu.memory_space<vmem>>, %arg3: memref<1x1xf32, #tpu.memory_space<smem>>, %arg4: memref<16x48xf32, #tpu.memory_space<vmem>>, %arg5: memref<16x1xf32, #tpu.memory_space<vmem>>) attributes {dimension_semantics = [#tpu.dimension_semantics<arbitrary>], iteration_bounds = array<i64: 1>, scalar_prefetch = 0 : i64, scratch_operands = 2 : i64, tpu.core_type = #tpu.core_type<tc>, window_params = [{transform_indices = @transform_0, window_bounds = array<i64: 1, 8>}, {transform_indices = @transform_1, window_bounds = array<i64: 8, 16>}, {transform_indices = @transform_2, window_bounds = array<i64: 1, 1>}]} {
    %c0_i32 = arith.constant 0 : i32
    %0 = arith.cmpi eq, %arg0, %c0_i32 : i32
    %1 = arith.extui %0 : i1 to i32
    %c0_i32_0 = arith.constant 0 : i32
    %2 = arith.cmpi ne, %1, %c0_i32_0 : i32
    scf.if %2 {
      %cst_17 = arith.constant 0.000000e+00 : f32
      %32 = vector.broadcast %cst_17 : f32 to vector<16x48xf32>
      %c0_18 = arith.constant 0 : index
      %c0_19 = arith.constant 0 : index
      %33 = vector.load %arg4[%c0_18, %c0_19] : memref<16x48xf32, #tpu.memory_space<vmem>>, vector<16x48xf32>
      tpu.vector_store %arg4[%c0_18, %c0_19], %32 {strides = array<i32>} : memref<16x48xf32, #tpu.memory_space<vmem>>, vector<16x48xf32>,
      %cst_20 = arith.constant 0.000000e+00 : f32
      %34 = vector.broadcast %cst_20 : f32 to vector<16x1xf32>
      %c0_21 = arith.constant 0 : index
      %c0_22 = arith.constant 0 : index
      %35 = vector.load %arg5[%c0_21, %c0_22] : memref<16x1xf32, #tpu.memory_space<vmem>>, vector<16x1xf32>
      tpu.vector_store %arg5[%c0_21, %c0_22], %34 {strides = array<i32>} : memref<16x1xf32, #tpu.memory_space<vmem>>, vector<16x1xf32>,
    } else {
    }
    %c0 = arith.constant 0 : index
    %c0_1 = arith.constant 0 : index
    %3 = vector.load %arg2[%c0, %c0_1] : memref<8x16xf32, #tpu.memory_space<vmem>>, vector<8x16xf32>
    %c0_2 = arith.constant 0 : index
    %c0_3 = arith.constant 0 : index
    %4 = vector.load %arg1[%c0_2, %c0_3] : memref<1x8xi32, #tpu.memory_space<vmem>>, vector<1x8xi32>
    %5 = arith.negf %3 : vector<8x16xf32>
    %6 = math.exp %5 : vector<8x16xf32>
    %cst = arith.constant 1.000000e+00 : f32
    %7 = vector.broadcast %cst : f32 to vector<8x16xf32>
    %8 = arith.addf %7, %6 : vector<8x16xf32>
    %9 = arith.divf %7, %8 : vector<8x16xf32>
    %cst_4 = arith.constant 1.000000e-07 : f32
    %10 = vector.broadcast %cst_4 : f32 to vector<8x16xf32>
    %11 = arith.addf %9, %10 : vector<8x16xf32>
    %12 = math.log %11 : vector<8x16xf32>
    %13 = arith.subf %12, %3 : vector<8x16xf32>
    %14 = tpu.iota {dimensions = array<i32: 0>} : vector<16x8xi32>
    %15 = vector.broadcast %4 : vector<1x8xi32> to vector<16x8xi32>
    %16 = arith.cmpi eq, %14, %15 : vector<16x8xi32>
    %17 = arith.extui %16 : vector<16x8xi1> to vector<16x8xi32>
    %18 = arith.sitofp %17 : vector<16x8xi32> to vector<16x8xf32>
    %c0_5 = arith.constant 0 : index
    %c0_6 = arith.constant 0 : index
    %19 = vector.load %arg5[%c0_5, %c0_6] : memref<16x1xf32, #tpu.memory_space<vmem>>, vector<16x1xf32>
    %cst_7 = arith.constant dense<0.000000e+00> : vector<16xf32>
    %20 = vector.multi_reduction <add>, %18, %cst_7 [1] : vector<16x8xf32> to vector<16xf32>
    %21 = vector.shape_cast %20 : vector<16xf32> to vector<16x1xf32>
    %22 = arith.addf %19, %21 : vector<16x1xf32>
    %c0_8 = arith.constant 0 : index
    %c0_9 = arith.constant 0 : index
    %23 = vector.load %arg5[%c0_8, %c0_9] : memref<16x1xf32, #tpu.memory_space<vmem>>, vector<16x1xf32>
    tpu.vector_store %arg5[%c0_8, %c0_9], %22 {strides = array<i32>} : memref<16x1xf32, #tpu.memory_space<vmem>>, vector<16x1xf32>,
    %24 = tpu.concatenate %9, %13, %12 in 1 : vector<8x16xf32>, vector<8x16xf32>, vector<8x16xf32> -> vector<8x48xf32>
    %c0_10 = arith.constant 0 : index
    %c0_11 = arith.constant 0 : index
    %25 = vector.load %arg4[%c0_10, %c0_11] : memref<16x48xf32, #tpu.memory_space<vmem>>, vector<16x48xf32>
    %cst_12 = arith.constant dense<0.000000e+00> : vector<16x48xf32>
    %26 = tpu.matmul %18, %24, %cst_12 {dimension_numbers = #tpu.dot_dimension_numbers<[1], [0], [0], [1], [0, 0, 1, 1], [], []>} : vector<16x8xf32>, vector<8x48xf32>, vector<16x48xf32> -> vector<16x48xf32>
    %27 = arith.addf %25, %26 : vector<16x48xf32>
    %c0_13 = arith.constant 0 : index
    %c0_14 = arith.constant 0 : index
    %28 = vector.load %arg4[%c0_13, %c0_14] : memref<16x48xf32, #tpu.memory_space<vmem>>, vector<16x48xf32>
    tpu.vector_store %arg4[%c0_13, %c0_14], %27 {strides = array<i32>} : memref<16x48xf32, #tpu.memory_space<vmem>>, vector<16x48xf32>,
    %c0_i32_15 = arith.constant 0 : i32
    %29 = arith.cmpi eq, %arg0, %c0_i32_15 : i32
    %30 = arith.extui %29 : i1 to i32
    %c0_i32_16 = arith.constant 0 : i32
    %31 = arith.cmpi ne, %30, %c0_i32_16 : i32
    scf.if %31 {
      %c0_17 = arith.constant 0 : index
      %c0_18 = arith.constant 0 : index
      %32 = vector.load %arg5[%c0_17, %c0_18] : memref<16x1xf32, #tpu.memory_space<vmem>>, vector<16x1xf32>
      %cst_19 = arith.constant 0.000000e+00 : f32
      %33 = vector.broadcast %cst_19 : f32 to vector<16x1xf32>
      %34 = arith.cmpf ogt, %32, %33 : vector<16x1xf32>
      %cst_20 = arith.constant 1.000000e+00 : f32
      %35 = vector.broadcast %cst_20 : f32 to vector<16x1xf32>
      %36 = arith.maximumf %32, %35 : vector<16x1xf32>
      %37 = tpu.reciprocal %36 {approx = true} : vector<16x1xf32> -> vector<16x1xf32>
      %c0_21 = arith.constant 0 : index
      %c0_22 = arith.constant 0 : index
      %38 = vector.load %arg4[%c0_21, %c0_22] : memref<16x48xf32, #tpu.memory_space<vmem>>, vector<16x48xf32>
      %39 = vector.extract_strided_slice %38 {offsets = [0, 0], sizes = [16, 16], strides = [1, 1]} : vector<16x48xf32> to vector<16x16xf32>
      %40 = vector.extract_strided_slice %38 {offsets = [0, 16], sizes = [16, 16], strides = [1, 1]} : vector<16x48xf32> to vector<16x16xf32>
      %41 = vector.extract_strided_slice %38 {offsets = [0, 32], sizes = [16, 16], strides = [1, 1]} : vector<16x48xf32> to vector<16x16xf32>
      %42 = tpu.iota {dimensions = array<i32: 0>} : vector<16x16xi32>
      %43 = tpu.iota {dimensions = array<i32: 1>} : vector<16x16xi32>
      %44 = arith.cmpi eq, %42, %43 : vector<16x16xi32>
      %45 = vector.broadcast %37 : vector<16x1xf32> to vector<16x16xf32>
      %46 = arith.mulf %41, %45 : vector<16x16xf32>
      %cst_23 = arith.constant 0.000000e+00 : f32
      %47 = vector.broadcast %cst_23 : f32 to vector<16x16xf32>
      %48 = arith.select %44, %46, %47 : vector<16x16xi1>, vector<16x16xf32>
      %49 = vector.shape_cast %48 : vector<16x16xf32> to vector<1x16x16xf32>
      %cst_24 = arith.constant dense<0.000000e+00> : vector<1xf32>
      %50 = vector.multi_reduction <add>, %49, %cst_24 [1, 2] : vector<1x16x16xf32> to vector<1xf32>
      %51 = vector.shape_cast %50 : vector<1xf32> to vector<1x1x1xf32>
      %52 = vector.extract %51[0, 0, 0] : f32 from vector<1x1x1xf32>
      %53 = vector.broadcast %37 : vector<16x1xf32> to vector<16x16xf32>
      %54 = arith.mulf %39, %53 : vector<16x16xf32>
      %55 = vector.broadcast %37 : vector<16x1xf32> to vector<16x16xf32>
      %56 = arith.mulf %40, %55 : vector<16x16xf32>
      %cst_25 = arith.constant dense<true> : vector<16x16xi1>
      %57 = arith.xori %44, %cst_25 : vector<16x16xi1>
      %58 = vector.broadcast %34 : vector<16x1xi1> to vector<16x16xi1>
      %59 = arith.andi %58, %57 : vector<16x16xi1>
      %cst_26 = arith.constant 1.000000e+00 : f32
      %60 = vector.broadcast %cst_26 : f32 to vector<16x16xf32>
      %61 = arith.mulf %60, %54 : vector<16x16xf32>
      %cst_27 = arith.constant -1.000000e+30 : f32
      %62 = vector.broadcast %cst_27 : f32 to vector<16x16xf32>
      %63 = arith.select %59, %61, %62 : vector<16x16xi1>, vector<16x16xf32>
      %cst_28 = arith.constant dense<0xFF800000> : vector<16xf32>
      %64 = vector.multi_reduction <maximumf>, %63, %cst_28 [0] : vector<16x16xf32> to vector<16xf32>
      %65 = vector.shape_cast %64 : vector<16xf32> to vector<1x16xf32>
      %66 = vector.broadcast %65 : vector<1x16xf32> to vector<16x16xf32>
      %67 = arith.subf %63, %66 : vector<16x16xf32>
      %68 = math.exp %67 : vector<16x16xf32>
      %cst_29 = arith.constant 0.000000e+00 : f32
      %69 = vector.broadcast %cst_29 : f32 to vector<16x16xf32>
      %70 = arith.select %59, %68, %69 : vector<16x16xi1>, vector<16x16xf32>
      %cst_30 = arith.constant dense<0.000000e+00> : vector<16xf32>
      %71 = vector.multi_reduction <add>, %70, %cst_30 [0] : vector<16x16xf32> to vector<16xf32>
      %72 = vector.shape_cast %71 : vector<16xf32> to vector<1x16xf32>
      %cst_31 = arith.constant 9.99999968E-21 : f32
      %73 = vector.broadcast %cst_31 : f32 to vector<1x16xf32>
      %74 = arith.maximumf %72, %73 : vector<1x16xf32>
      %75 = tpu.reciprocal %74 {approx = true} : vector<1x16xf32> -> vector<1x16xf32>
      %76 = vector.broadcast %75 : vector<1x16xf32> to vector<16x16xf32>
      %77 = arith.mulf %70, %76 : vector<16x16xf32>
      %78 = arith.mulf %77, %56 : vector<16x16xf32>
      %79 = vector.shape_cast %78 : vector<16x16xf32> to vector<1x16x16xf32>
      %cst_32 = arith.constant dense<0.000000e+00> : vector<1xf32>
      %80 = vector.multi_reduction <add>, %79, %cst_32 [1, 2] : vector<1x16x16xf32> to vector<1xf32>
      %81 = vector.shape_cast %80 : vector<1xf32> to vector<1x1x1xf32>
      %82 = vector.extract %81[0, 0, 0] : f32 from vector<1x1x1xf32>
      %83 = arith.addf %52, %82 : f32
      %cst_33 = arith.constant 0.000000e+00 : f32
      %84 = arith.subf %cst_33, %83 : f32
      %c0_34 = arith.constant 0 : index
      %c0_35 = arith.constant 0 : index
      %85 = memref.load %arg3[%c0_34, %c0_35] : memref<1x1xf32, #tpu.memory_space<smem>>
      memref.store %84, %arg3[%c0_34, %c0_35] : memref<1x1xf32, #tpu.memory_space<smem>>
    } else {
    }
    return
  }
  func.func @transform_0(%arg0: i32) -> (i32, i32) {
    %c0_i32 = arith.constant 0 : i32
    %c0_i32_0 = arith.constant 0 : i32
    return %c0_i32, %arg0 : i32, i32
  }
  func.func @transform_1(%arg0: i32) -> (i32, i32) {
    %c0_i32 = arith.constant 0 : i32
    %c0_i32_0 = arith.constant 0 : i32
    return %arg0, %c0_i32 : i32, i32
  }
  func.func @transform_2(%arg0: i32) -> (i32, i32) {
    %c0_i32 = arith.constant 0 : i32
    %c0_i32_0 = arith.constant 0 : i32
    %c0_i32_1 = arith.constant 0 : i32
    return %c0_i32, %c0_i32_0 : i32, i32
  }
}

</mosaic_0001>

<bundles_post_ra>
// kernel: tpu_custom_call.1
= control target key start
LH: loop header
LB: loop body
LE: loop exit
PB: predicated region body
PF: predicated region fallthrough
CT: control target
= control target key end

     0   :  { %7 = vsyncpa [#allocation5], 0  ;;  %s548_s0 = inlined_call_operand.hbm [shape: s32[1,8], index: 0, kind: input, shape index: {}]   ;;  %s549_s1 = inlined_call_operand.hbm [shape: f32[8,16], index: 1, kind: input, shape index: {}]   ;;  %s550_s2 = inlined_call_operand.hbm [shape: f32[1,1], index: 2, kind: output, shape index: {}]  }
   0x1   :  { %8 = vsyncpa [#allocation8], 0 }
   0x2   :  { %9 = vsyncpa [#allocation6], 0  ;;  %s427_s9 = smov [#allocation4]   ;;  %s428_s11 = smov [#allocation7]  }
   0x3   :  { %s16_s10 = sshll.u32 %s427_s9, 4  ;;  %s26_s12 = sshll.u32 %s428_s11, 4  ;;  %s17_s10 = int_to_ptr.vmem [resolvable:$true] %s16_s10  ;;  %s27_s12 = int_to_ptr.vmem [resolvable:$true] %s26_s12 }
   0x4   :  { %s367_s15 = scalar_lea.hbm %s548_s0, 16 }
   0x5   :  { %p368_p0 = scmp.ne.s32.totalorder %s548_s0, %s367_s15  ;;  %p371_p1 = scmp.lt.u32.totalorder %s367_s15, %s548_s0 }
   0x7   :  { %p373_p2 = pnand %p371_p1, %p368_p0 }
   0x9   :  { %376 = shalt.err (!%p373_p2)
}
   0xa   :  { %s377_s20 = scalar_lea.vmem %s17_s10, 16  ;;  %s381_s21 = scalar_lea.vmem %s17_s10, 32 }
   0xb   :  { %p378_p3 = scmp.ne.s32.totalorder %s17_s10, %s377_s20  ;;  %p382_p4 = scmp.lt.s32.totalorder %s17_s10, %s17_s10 }
   0xc   :  { %p383_p5 = scmp.lt.s32.totalorder %s381_s21, %s377_s20 }
   0xe   :  { %p384_p6 = por %p383_p5, %p382_p4 }
  0x10   :  { %p385_p7 = pnand %p384_p6, %p378_p3 }
  0x12   :  { %388 = shalt.err (!%p385_p7)
}
  0x13   :  { %19 = dma.hbm_to_vmem [thread:$0]  %s548_s0, 16, %s17_s10, [#allocation5]  }
  0x14   :  { %s389_s26 = scalar_lea.hbm %s549_s1, 128 }
  0x15   :  { %p390_p8 = scmp.ne.s32.totalorder %s549_s1, %s389_s26  ;;  %p393_p9 = scmp.lt.u32.totalorder %s389_s26, %s549_s1 }
  0x17   :  { %p395_p10 = pnand %p393_p9, %p390_p8 }
  0x19   :  { %398 = shalt.err (!%p395_p10)
}
  0x1a   :  { %s399_s3 = scalar_lea.vmem %s27_s12, 128  ;;  %p404_p12 = scmp.lt.s32.totalorder %s27_s12, %s27_s12 }
  0x1b   :  { %p400_p11 = scmp.ne.s32.totalorder %s27_s12, %s399_s3  ;;  %p405_p13 = scmp.lt.s32.totalorder %s399_s3, %s399_s3 }
  0x1d   :  { %p406_p0 = por %p405_p13, %p404_p12 }
  0x1f   :  { %p407_p1 = pnand %p406_p0, %p400_p11 }
  0x21   :  { %410 = shalt.err (!%p407_p1)
}
  0x22   :  { %29 = dma.hbm_to_vmem [thread:$0]  %s549_s1, 128, %s27_s12, [#allocation8]  }
  0x23   :  { %421 = dma.done.wait [#allocation5], 16  }
  0x24   :  { %422 = vsyncadd [#allocation5], 4294967280 }
  0x25   :  { %423 = dma.done.wait [#allocation8], 128  }
  0x26   :  { %424 = vsyncadd [#allocation8], 4294967168  ;;  %v58_v0 = vlaneseq  ;;  %v46_v3 = vld [vmem:[#allocation7] sm:$0xff]  ;;  %v322_v4 = vld [vmem:[#allocation4] ss:$0 sm:$0xff]  ;;  %vm73_vm0 = vcmask 64512  }
  0x27   :  { %v321_v5 = vmul.f32 -1.442695, %v46_v3  ;;  %v429_v6 = vmov 0.0   ;;  %vm43_vm3 = vcmask 7168   ;;  %v430_v16 = vmov 0   ;;  %s431_s1 = smov 16  }
  0x28   :  { %v477_v1 = vshrl.u32 %v58_v0, 7  ;;  %44 = vst.msk [vmem:[#allocation3] sm:$0xff] %vm43_vm3, %v429_v6  ;;  %45 = vst.msk [vmem:[#allocation3 + $0x8] sm:$0xff] %vm43_vm3, %v429_v6  ;;  %349 = vset.pattern.permute.xlu0 %v430_v16  ;;  %350 = vset.pattern.permute.xlu1 %v430_v16  ;;  %s432_s5 = smov 32   ;;  %vm93_vm4 = vcmask 130048   ;;  %vm95_vm5 = vcmask 261120  }
  0x29   :  { %351 = vpow2.f32 %v321_v5  ;;  %vm40_vm8 = vcmask 392192   ;;  %v494_v45 = vand.u32 127, %v58_v0  ;;  %s433_s6 = smov 112   ;;  %vm434_vm11 = vmmov 1   ;;  %s435_s7 = smov 96  }
  0x2a   :  { %v480_v2 = vadd.s32 8, %v477_v1  ;;  %vm65_vm1 = vcmp.eq.s32.totalorder %v477_v1, %v322_v4  ;;  %42 = vst.msk [vmem:[#allocation2 + $0x8] sm:$0xff] %vm40_vm8, %v429_v6  ;;  %41 = vst.msk [vmem:[#allocation2] sm:$0xff] %vm40_vm8, %v429_v6  ;;  %s411_s14 = scalar_lea.hbm %s550_s2, 16 }
  0x2b   :  { %v323_v7 = vsel %vm65_vm1, 1.0, %v429_v6  ;;  %vm200_vm9 = vcmp.eq.s32.totalorder %v477_v1, %v494_v45  ;;  %p412_p2 = scmp.ne.s32.totalorder %s550_s2, %s411_s14  ;;  %p415_p3 = scmp.lt.u32.totalorder %s411_s14, %s550_s2 }
  0x2c   :  { %vm66_vm2 = vcmp.eq.s32.totalorder %v480_v2, %v322_v4  ;;  %v74_v9 = vsel %vm73_vm0, %v323_v7, 0.0  ;;  %332 = vmatprep.mubr.msk.f32.mxu0 %vm73_vm0, %v323_v7  ;;  %vm201_vm10 = vcmp.eq.s32.totalorder %v480_v2, %v494_v45  ;;  %vm236_vm12 = vmxor %vm200_vm9, %vm434_vm11 }
  0x2d   :  { %v324_v8 = vsel %vm66_vm2, 1.0, %v429_v6  ;;  %75 = vadd.xlane.f32.xlu1 %v74_v9  ;;  %vm237_vm14 = vmxor %vm201_vm10, %vm434_vm11  ;;  %p417_p4 = pnand %p415_p3, %p412_p2 }
  0x2e   :  { %v77_v10 = vsel %vm73_vm0, %v324_v8, 0.0 }
  0x2f   :  { %v71_v19 = vld [vmem:[#allocation3] sm:$0xff]  ;;  %v72_v22 = vld [vmem:[#allocation3 + $0x8] sm:$0xff] }
  0x31   :  { %78 = vadd.xlane.f32.xlu1 %v77_v10  ;;  %v98_v37 = vld [vmem:[#allocation2 + $0x8] sm:$0xff]  ;;  %v97_v38 = vld [vmem:[#allocation2] sm:$0xff] }
  0x33   :  { %v352_v11 = vpop.eup %351 }
  0x34   :  { %v51_v12 = vadd.f32 1.0, %v352_v11 }
  0x36   :  { %353 = vrcp.f32 %v51_v12 }
  0x40   :  { %v354_v13 = vpop.eup %353 }
  0x41   :  { %v54_v14 = vadd.f32 1e-07, %v354_v13 }
  0x43   :  { %355 = vlog2.f32 %v54_v14 }
  0x4d   :  { %v356_v15 = vpop.eup %355 }
  0x4e   :  { %v56_v17 = vmul.f32 0.6931472, %v356_v15 }
  0x50   :  { %v57_v18 = vsub.f32 %v56_v17, %v46_v3 }
  0x52   :  { %86 = vrot.lane.b32.xlu0 %v57_v18, %s431_s1 }
  0x56   :  { %90 = vrot.lane.b32.xlu0 %v56_v17, %s432_s5 }
  0xba   :  { %v76_v20 = vpop.xlane.xlu1 %75 }
  0xbb   :  { %v80_v21 = vadd.f32 %v76_v20, %v71_v19 }
  0xbd   :  { %83 = vst.msk [vmem:[#allocation3] sm:$0xff] %vm43_vm3, %v80_v21 }
  0xbe   :  { %v79_v23 = vpop.xlane.xlu1 %78 }
  0xbf   :  { %v81_v24 = vadd.f32 %v79_v23, %v72_v22 }
  0xc1   :  { %84 = vst.msk [vmem:[#allocation3 + $0x8] sm:$0xff] %vm43_vm3, %v81_v24 }
  0xc4   :  { %v188_v25 = vld [vmem:[#allocation3] sm:$0xff]  ;;  %v87_v27 = vpop.permute.xlu0 %86 }
  0xc5   :  { %v192_v26 = vmax.f32 %v188_v25, 1.0  ;;  %v94_v30 = vsel %vm93_vm4, %v354_v13, %v87_v27  ;;  %vm190_vm6 = vcmp.gt.f32.partialorder %v188_v25, 0.0 }
  0xc6   :  { %v238_v34 = vsel %vm190_vm6, 1, %v430_v16 }
  0xc7   :  { %357 = vrcp.f32 %v192_v26 }
  0xc8   :  { %v189_v28 = vld [vmem:[#allocation3 + $0x8] sm:$0xff]  ;;  %v91_v31 = vpop.permute.xlu0 %90 }
  0xc9   :  { %v193_v29 = vmax.f32 %v189_v28, 1.0  ;;  %v96_v32 = vsel %vm95_vm5, %v94_v30, %v91_v31  ;;  %vm191_vm7 = vcmp.gt.f32.partialorder %v189_v28, 0.0 }
  0xca   :  { %330 = vmatprep.subr.mxu0 %v96_v32  ;;  %v239_v36 = vsel %vm191_vm7, 1, %v430_v16 }
  0xcb   :  { %359 = vrcp.f32 %v193_v29  ;;  %331 = vmatpush3.msra.mxu0 %v96_v32 }
  0xcc   :  { %333 = vmatmul.mubr.msk.f32.vlgmr.msra.gmra.mrb[0].mxu0 %vm73_vm0, %v324_v8 }
  0xd1   :  { %v358_v33 = vpop.eup %357 }
  0xd2   :  { %204 = vperm.xlu0 %349, %v358_v33  }
  0xd5   :  { %v360_v35 = vpop.eup %359 }
  0xd6   :  { %241 = vperm.xlu0 %349, %v238_v34   ;;  %209 = vperm.xlu1 %350, %v360_v35  }
  0xda   :  { %244 = vperm.xlu0 %349, %v239_v36  }
 0x151   :  { %v205_v39 = vpop.permute.xlu0 %204 }
 0x155   :  { %v242_v44 = vpop.permute.xlu0 %241  ;;  %v210_v46 = vpop.permute.xlu1 %209 }
 0x156   :  { %vm246_vm13 = vcmp.eq.s32.totalorder %v242_v44, 1 }
 0x157   :  { %vm506_vm0 = vmand %vm246_vm13, %vm236_vm12 }
 0x159   :  { %v245_v50 = vpop.permute.xlu0 %244 }
 0x15a   :  { %vm247_vm15 = vcmp.eq.s32.totalorder %v245_v50, 1 }
 0x15b   :  { %vm510_vm1 = vmand %vm247_vm15, %vm237_vm14 }
 0x19f   :  { %v334_v40 = vpop.f32.mrb[0].mxu0 }
 0x1a0   :  { %v181_v41 = vadd.f32 %v334_v40, %v98_v37  ;;  %v171_v42 = vpop.f32.mrb[1].mxu0 }
 0x1a1   :  { %v180_v43 = vadd.f32 %v171_v42, %v97_v38 }
 0x1a2   :  { %184 = vst.msk [vmem:[#allocation2 + $0x8] sm:$0xff] %vm40_vm8, %v181_v41 }
 0x1a3   :  { %183 = vst.msk [vmem:[#allocation2] sm:$0xff] %vm40_vm8, %v180_v43 }
 0x1a9   :  { %v197_v47 = vld [vmem:[#allocation2 + $0x8] sm:$0xff] }
 0x1aa   :  { %v213_v48 = vmul.f32 %v210_v46, %v197_v47  ;;  %v196_v49 = vld [vmem:[#allocation2] sm:$0xff] }
 0x1ab   :  { %v212_v51 = vmul.f32 %v205_v39, %v196_v49 }
 0x1ac   :  { %284 = vrot.lane.b32.xlu1 %v213_v48, %s433_s6  ;;  %v251_v54 = vsel %vm510_vm1, %v213_v48, -1e+30 }
 0x1ad   :  { %282 = vrot.lane.b32.xlu0 %v212_v51, %s433_s6  ;;  %v250_v55 = vsel %vm506_vm0, %v212_v51, -1e+30  ;;  %v253_v56 = vsel %vm93_vm4, %v251_v54, -inf }
 0x1ae   :  { %v252_v57 = vsel %vm93_vm4, %v250_v55, -inf }
 0x1af   :  { %v254_v58 = vmax.f32 %v252_v57, %v253_v56 }
 0x1b0   :  { %218 = vrot.lane.b32.xlu1 %v213_v48, %s435_s7 }
 0x1b1   :  { %216 = vrot.lane.b32.xlu0 %v212_v51, %s435_s7  ;;  %v255_v59 = vrot.slane %v254_v58, 4 }
 0x1b3   :  { %v256_v60 = vmax.f32 %v254_v58, %v255_v59 }
 0x1b5   :  { %v257_v61 = vrot.slane %v256_v60, 2 }
 0x1b7   :  { %v258_v62 = vmax.f32 %v256_v60, %v257_v61 }
 0x1b9   :  { %v259_v63 = vrot.slane %v258_v62, 1 }
 0x1bb   :  { %v260_v0 = vmax.f32 %v258_v62, %v259_v63 }
 0x1bd   :  { %v261_v3 = vsub.f32 %v250_v55, %v260_v0  ;;  %v262_v4 = vsub.f32 %v251_v54, %v260_v0 }
 0x1bf   :  { %v263_v5 = vmul.f32 1.442695, %v261_v3  ;;  %v265_v6 = vmul.f32 1.442695, %v262_v4 }
 0x1c1   :  { %361 = vpow2.f32 %v263_v5 }
 0x1c2   :  { %363 = vpow2.f32 %v265_v6 }
 0x1cb   :  { %v362_v7 = vpop.eup %361 }
 0x1cc   :  { %v364_v8 = vpop.eup %363  ;;  %v267_v9 = vsel %vm506_vm0, %v362_v7, 0.0 }
 0x1cd   :  { %v268_v10 = vsel %vm510_vm1, %v364_v8, 0.0  ;;  %v269_v11 = vsel %vm93_vm4, %v267_v9, 0.0 }
 0x1ce   :  { %v270_v12 = vsel %vm93_vm4, %v268_v10, 0.0 }
 0x1cf   :  { %v271_v13 = vadd.f32 %v270_v12, %v269_v11 }
 0x1d1   :  { %v272_v14 = vrot.slane %v271_v13, 4 }
 0x1d3   :  { %v273_v15 = vadd.f32 %v272_v14, %v271_v13 }
 0x1d5   :  { %v274_v16 = vrot.slane %v273_v15, 2 }
 0x1d7   :  { %v275_v17 = vadd.f32 %v274_v16, %v273_v15 }
 0x1d9   :  { %v276_v18 = vrot.slane %v275_v17, 1 }
 0x1db   :  { %v277_v19 = vadd.f32 %v276_v18, %v275_v17 }
 0x1dd   :  { %v278_v20 = vmax.f32 %v277_v19, 1e-20 }
 0x1df   :  { %365 = vrcp.f32 %v278_v20 }
 0x1e9   :  { %v366_v21 = vpop.eup %365 }
 0x1ea   :  { %v281_v22 = vmul.f32 %v366_v21, %v268_v10  ;;  %v280_v24 = vmul.f32 %v366_v21, %v267_v9 }
 0x21e   :  { %v285_v23 = vpop.permute.xlu1 %284 }
 0x21f   :  { %v289_v25 = vmul.f32 %v285_v23, %v281_v22  ;;  %v283_v26 = vpop.permute.xlu0 %282 }
 0x220   :  { %v288_v27 = vmul.f32 %v283_v26, %v280_v24 }
 0x221   :  { %v291_v28 = vsel %vm93_vm4, %v289_v25, 0.0 }
 0x222   :  { %v219_v29 = vpop.permute.xlu1 %218  ;;  %v290_v30 = vsel %vm93_vm4, %v288_v27, 0.0 }
 0x223   :  { %v223_v31 = vsel %vm201_vm10, %v219_v29, 0.0  ;;  %v217_v32 = vpop.permute.xlu0 %216  ;;  %v292_v33 = vadd.f32 %v291_v28, %v290_v30 }
 0x224   :  { %v225_v34 = vsel %vm93_vm4, %v223_v31, 0.0  ;;  %v222_v35 = vsel %vm200_vm9, %v217_v32, 0.0 }
 0x225   :  { %v224_v36 = vsel %vm93_vm4, %v222_v35, 0.0  ;;  %293 = vadd.xlane.f32.xlu1 %v292_v33 }
 0x226   :  { %v226_v37 = vadd.f32 %v225_v34, %v224_v36 }
 0x228   :  { %227 = vadd.xlane.f32.xlu0 %v226_v37 }
 0x2b2   :  { %v294_v38 = vpop.xlane.xlu1 %293 }
 0x2b3   :  { %v295_v39 = vrot.slane %v294_v38, 4 }
 0x2b5   :  { %v296_v40 = vadd.f32 %v295_v39, %v294_v38  ;;  %v228_v41 = vpop.xlane.xlu0 %227 }
 0x2b6   :  { %v229_v42 = vrot.slane %v228_v41, 4 }
 0x2b7   :  { %v297_v2 = vrot.slane %v296_v40, 2 }
 0x2b8   :  { %v230_v43 = vadd.f32 %v229_v42, %v228_v41 }
 0x2b9   :  { %v298_v44 = vadd.f32 %v297_v2, %v296_v40 }
 0x2ba   :  { %v231_v46 = vrot.slane %v230_v43, 2 }
 0x2bb   :  { %v299_v48 = vrot.slane %v298_v44, 1 }
 0x2bc   :  { %v232_v47 = vadd.f32 %v231_v46, %v230_v43 }
 0x2bd   :  { %v300_v1 = vadd.f32 %v299_v48, %v298_v44 }
 0x2be   :  { %v233_v49 = vrot.slane %v232_v47, 1 }
 0x2c0   :  { %v234_v50 = vadd.f32 %v233_v49, %v232_v47 }
 0x2c2   :  { %335 = vpush %v234_v50 }
 0x2c3   :  { %337 = vpush %v300_v1 }
 0x2f3   :  { %s336_s8 = spop %335 }
 0x2f4   :  { %s338_s9 = spop %337 }
 0x2f5   :  { %s302_s10 = sadd.f32 %s338_s9, %s336_s8 }
 0x2f7   :  { %s303_s11 = ssub.f32 0.0, %s302_s10 }
 0x2f9   :  { %305 = sst [smem:[#allocation9]] %s303_s11 }
 0x2fa   :  { %420 = shalt.err (!%p417_p4)
}
 0x2fb   :  { %s436_s19 = smov [#allocation9]  }
 0x2fc   :  { %313 = dma.smem_to_hbm %s436_s19, 16, %s550_s2, [#allocation6]  }
 0x2fd   :  { %425 = dma.done.wait [#allocation6], 16  }
 0x2fe   :  { %426 = vsyncadd [#allocation6], 4294967280 }
 0x2ff   :  { %317 = sfence }
 0x300   :  { %318 = vsyncpa [#allocation5], 1 }
 0x301   :  { %319 = vsyncpa [#allocation8], 1 }
 0x302   :  { %320 = vsyncpa [#allocation6], 1 }

</bundles_post_ra>
